<compile_context>
chip_gen: v6e
topology: v6e:2x2x1
jax: 0.10.0
libtpu: 0.0.40
codegen_flags: <defaults>
</compile_context>

<pallas_src>
import math
import functools

import numpy as np
import jax
import jax.numpy as jnp
from jax.experimental import pallas as pl
from jax.experimental.pallas import tpu as pltpu

D_MODEL = 8
N_HEADS = 4
D_FFN = D_MODEL * 4
LN_EPS = 1e-5              # PyTorch nn.LayerNorm default eps
NEG_INF = -10000000000.0   # same constant as masked_fill in the reference


def _encoder_layer_kernel(src_ref, mask_ref, wqkv_ref, bqkv_ref, wo_ref,
                          w1_ref, b1_ref, w2_ref, vec_ref,
                          out_ref, attn_ref, *, n_heads):
    """One grid step = `batch_block` batch elements, fully resident in VMEM.

    vec_ref rows: 0=bo, 1=b2, 2=ln1_g, 3=ln1_b, 4=ln2_g, 5=ln2_b,
                  6..6+n_heads-1 = head_mask (1 where feature belongs to head h).
    """
    Bb, S, D = src_ref.shape
    d_key = D // n_heads
    scale = 1.0 / math.sqrt(d_key)

    x = src_ref[...]                                  # (Bb, S, D)
    xf = x.reshape(Bb * S, D)                         # flatten batch*seq rows

    # ---- fused Q/K/V projection: one (Bb*S, D) x (D, 3D) MXU matmul ----
    qkv = jnp.dot(xf, wqkv_ref[...],
                  preferred_element_type=jnp.float32) + bqkv_ref[...]
    q = qkv[:, :D].reshape(Bb, S, D)
    k = qkv[:, D:2 * D].reshape(Bb, S, D)
    v = qkv[:, 2 * D:].reshape(Bb, S, D)

    # ---- all heads at once (no per-head loop, no lane slicing) ----
    # Masking Q per head keeps the contraction over the full lane-resident
    # feature dim; the cross-head terms are exactly zero.
    head_mask = vec_ref[6:6 + n_heads, :]             # (H, D)
    qm = q[:, None, :, :] * head_mask[None, :, None, :]   # (Bb, H, S, D)
    qm = qm.reshape(Bb, n_heads * S, D)

    scores = jnp.einsum('bmd,bkd->bmk', qm, k,
                        preferred_element_type=jnp.float32) * scale  # (Bb, H*S, S)

    # mask computed/applied once for all heads (replace, like masked_fill)
    mask = mask_ref[...]                              # (Bb, 1, S)
    scores = jnp.where(mask == 0.0, jnp.float32(NEG_INF), scores)

    # numerically-stable softmax over keys; reciprocal on the EUP slot
    scores = scores - jnp.max(scores, axis=-1, keepdims=True)
    e = jnp.exp(scores)
    denom = jnp.sum(e, axis=-1, keepdims=True)
    probs = e * pl.reciprocal(denom, approx=True)     # (Bb, H*S, S)

    # single store of all heads' probabilities (dropout = identity in eval)
    attn_ref[...] = probs.reshape(Bb, n_heads, S, S)

    # context for all heads in one batched matmul; keep each head's own columns
    ctx = jnp.einsum('bmk,bkd->bmd', probs, v,
                     preferred_element_type=jnp.float32)  # (Bb, H*S, D)
    ctx = ctx.reshape(Bb, n_heads, S, D) * head_mask[None, :, None, :]
    a = jnp.sum(ctx, axis=1).reshape(Bb * S, D)       # == concat of heads

    attn_out = jnp.dot(a, wo_ref[...],
                       preferred_element_type=jnp.float32) + vec_ref[0:1, :]

    # ---- residual + LayerNorm 1 ----
    y = xf + attn_out
    mu = jnp.mean(y, axis=-1, keepdims=True)
    var = jnp.mean((y - mu) ** 2, axis=-1, keepdims=True)
    y = (y - mu) * jax.lax.rsqrt(var + LN_EPS) * vec_ref[2:3, :] + vec_ref[3:4, :]

    # ---- position-wise FFN (rows already flattened for the MXU) ----
    h1 = jnp.dot(y, w1_ref[...], preferred_element_type=jnp.float32) + b1_ref[...]
    h1 = jnp.maximum(h1, 0.0)                         # ReLU
    ffn = jnp.dot(h1, w2_ref[...],
                  preferred_element_type=jnp.float32) + vec_ref[1:2, :]

    # ---- residual + LayerNorm 2 ----
    z = y + ffn
    mu2 = jnp.mean(z, axis=-1, keepdims=True)
    var2 = jnp.mean((z - mu2) ** 2, axis=-1, keepdims=True)
    z = (z - mu2) * jax.lax.rsqrt(var2 + LN_EPS) * vec_ref[4:5, :] + vec_ref[5:6, :]

    out_ref[...] = z.reshape(Bb, S, D)


def encoder_layer(src, src_mask, params, *, n_heads=N_HEADS, batch_block=None):
    """src: (B, S, D) f32; src_mask: (B, 1, S) f32 (1 keep / 0 pad)."""
    B, S, D = src.shape
    F = params["w1"].shape[1]
    assert D % n_heads == 0
    d_key = D // n_heads

    # ---- host-side parameter packing (18 tiny operands -> 7 arrays) ----
    wqkv = jnp.concatenate([params["wq"], params["wk"], params["wv"]], axis=1)  # (D, 3D)
    bqkv = jnp.concatenate([params["bq"], params["bk"], params["bv"]], axis=1)  # (1, 3D)
    head_mask = (jnp.arange(D)[None, :] // d_key
                 == jnp.arange(n_heads)[:, None]).astype(jnp.float32)           # (H, D)
    vec = jnp.concatenate([params["bo"], params["b2"],
                           params["ln1_g"], params["ln1_b"],
                           params["ln2_g"], params["ln2_b"],
                           head_mask], axis=0)                                  # (6+H, D)

    # ---- batch tiling: flatten as many rows as possible into each matmul;
    # split into 2 parallel blocks (v7x has 2 TensorCores) only when each
    # block still feeds >=128 rows to the MXU.  At large S the per-block attn
    # buffer stays small because we tile over batch (v7x 64 MiB VMEM safe). ----
    if batch_block is None:
        half = (B + 1) // 2
        batch_block = half if half * S >= 128 else B
    batch_block = max(1, min(batch_block, B))
    grid = (pl.cdiv(B, batch_block),)

    def rep(shape):
        zeros = (0,) * len(shape)
        return pl.BlockSpec(shape, lambda b, z=zeros: z)   # replicated param

    in_specs = [
        pl.BlockSpec((batch_block, S, D), lambda b: (b, 0, 0)),          # src
        pl.BlockSpec((batch_block, 1, S), lambda b: (b, 0, 0)),          # mask
        rep((D, 3 * D)), rep((1, 3 * D)),                                # Wqkv, bqkv
        rep((D, D)),                                                     # Wo
        rep((D, F)), rep((1, F)),                                        # W1, b1
        rep((F, D)),                                                     # W2
        rep((6 + n_heads, D)),                                           # packed vectors
    ]
    out_specs = (
        pl.BlockSpec((batch_block, S, D), lambda b: (b, 0, 0)),
        pl.BlockSpec((batch_block, n_heads, S, S), lambda b: (b, 0, 0, 0)),
    )
    out_shape = (
        jax.ShapeDtypeStruct((B, S, D), jnp.float32),
        jax.ShapeDtypeStruct((B, n_heads, S, S), jnp.float32),
    )

    kernel = functools.partial(_encoder_layer_kernel, n_heads=n_heads)
    return pl.pallas_call(
        kernel,
        grid=grid,
        in_specs=in_specs,
        out_specs=out_specs,
        out_shape=out_shape,
        compiler_params=pltpu.CompilerParams(
            dimension_semantics=("parallel",)),
    )(src, src_mask, wqkv, bqkv, params["wo"], params["w1"], params["b1"],
      params["w2"], vec)


def _init_linear(key, fan_in, fan_out):
    """Deterministic nn.Linear-style init; weight stored as (in, out)."""
    bound = 1.0 / math.sqrt(fan_in)
    kw, kb = jax.random.split(key)
    w = jax.random.uniform(kw, (fan_in, fan_out), jnp.float32, -bound, bound)
    b = jax.random.uniform(kb, (1, fan_out), jnp.float32, -bound, bound)
    return w, b


def _reference(src, mask, p, n_heads=N_HEADS):
    """NumPy float32 reference of the PyTorch EncoderLayer forward (eval mode)."""
    x = np.asarray(src, np.float32)
    m = np.asarray(mask, np.float32)
    B, S, D = x.shape
    dk = D // n_heads

    def lin(a, w, b):
        return a @ np.asarray(w, np.float32) + np.asarray(b, np.float32)

    q = lin(x, p["wq"], p["bq"]).reshape(B, S, n_heads, dk).transpose(0, 2, 1, 3)
    k = lin(x, p["wk"], p["bk"]).reshape(B, S, n_heads, dk).transpose(0, 2, 1, 3)
    v = lin(x, p["wv"], p["bv"]).reshape(B, S, n_heads, dk).transpose(0, 2, 1, 3)
    s = q @ k.transpose(0, 1, 3, 2) / math.sqrt(dk)                # (B,H,S,S)
    s = np.where(m[:, :, None, :] == 0.0, np.float32(NEG_INF), s)
    s = s - s.max(-1, keepdims=True)
    e = np.exp(s)
    probs = e / e.sum(-1, keepdims=True)
    a = (probs @ v).transpose(0, 2, 1, 3).reshape(B, S, D)
    attn_out = lin(a, p["wo"], p["bo"])

    def ln(y, g, b):
        mu = y.mean(-1, keepdims=True)
        var = ((y - mu) ** 2).mean(-1, keepdims=True)
        return (y - mu) / np.sqrt(var + LN_EPS) * np.asarray(g) + np.asarray(b)

    y = ln(x + attn_out, p["ln1_g"], p["ln1_b"])
    h1 = np.maximum(lin(y, p["w1"], p["b1"]), 0.0)
    z = ln(y + lin(h1, p["w2"], p["b2"]), p["ln2_g"], p["ln2_b"])
    return z, probs


if __name__ == "__main__":
    key = jax.random.PRNGKey(0)
    B, S = 2, 8
    ks = jax.random.split(key, 8)

    wq, bq = _init_linear(ks[0], D_MODEL, D_MODEL)
    wk, bk = _init_linear(ks[1], D_MODEL, D_MODEL)
    wv, bv = _init_linear(ks[2], D_MODEL, D_MODEL)
    wo, bo = _init_linear(ks[3], D_MODEL, D_MODEL)
    w1, b1 = _init_linear(ks[4], D_MODEL, D_FFN)
    w2, b2 = _init_linear(ks[5], D_FFN, D_MODEL)

    params = dict(
        wq=wq, bq=bq, wk=wk, bk=bk, wv=wv, bv=bv, wo=wo, bo=bo,
        ln1_g=jnp.ones((1, D_MODEL), jnp.float32),
        ln1_b=jnp.zeros((1, D_MODEL), jnp.float32),
        w1=w1, b1=b1, w2=w2, b2=b2,
        ln2_g=jnp.ones((1, D_MODEL), jnp.float32),
        ln2_b=jnp.zeros((1, D_MODEL), jnp.float32),
    )

    src = jax.random.normal(ks[6], (B, S, D_MODEL), jnp.float32)
    # mask: second sequence has its last 2 tokens as padding
    src_mask = jnp.ones((B, 1, S), jnp.float32).at[1, 0, 6:].set(0.0)

    out, attn_probs = encoder_layer(src, src_mask, params)
    jax.block_until_ready((out, attn_probs))
    assert out.shape == (B, S, D_MODEL)
    assert attn_probs.shape == (B, N_HEADS, S, S)

    # self-check vs NumPy f32 reference (tolerance covers the approx
    # reciprocal used for the softmax normalization)
    ref_out, ref_attn = _reference(src, src_mask, params)
    assert np.allclose(np.asarray(out), ref_out, rtol=2e-2, atol=2e-2)
    assert np.allclose(np.asarray(attn_probs), ref_attn, rtol=2e-2, atol=2e-2)

    print("KERNEL_OK")
</pallas_src>

<mosaic_0001>
module attributes {stable_mosaic.version = 11 : i64} {
  func.func @_encoder_layer_kernel(%arg0: i32, %arg1: memref<2x8x8xf32, #tpu.memory_space<vmem>>, %arg2: memref<2x1x8xf32, #tpu.memory_space<vmem>>, %arg3: memref<8x24xf32, #tpu.memory_space<vmem>>, %arg4: memref<1x24xf32, #tpu.memory_space<vmem>>, %arg5: memref<8x8xf32, #tpu.memory_space<vmem>>, %arg6: memref<8x32xf32, #tpu.memory_space<vmem>>, %arg7: memref<1x32xf32, #tpu.memory_space<vmem>>, %arg8: memref<32x8xf32, #tpu.memory_space<vmem>>, %arg9: memref<10x8xf32, #tpu.memory_space<vmem>>, %arg10: memref<2x8x8xf32, #tpu.memory_space<vmem>>, %arg11: memref<2x4x8x8xf32, #tpu.memory_space<vmem>>) attributes {dimension_semantics = [#tpu.dimension_semantics<parallel>], iteration_bounds = array<i64: 1>, scalar_prefetch = 0 : i64, scratch_operands = 0 : i64, tpu.core_type = #tpu.core_type<tc>, window_params = [{transform_indices = @transform_0, window_bounds = array<i64: 2, 8, 8>}, {transform_indices = @transform_1, window_bounds = array<i64: 2, 1, 8>}, {pipeline_mode = #tpu.pipeline_mode<synchronous>, transform_indices = @transform_2, window_bounds = array<i64: 8, 24>}, {pipeline_mode = #tpu.pipeline_mode<synchronous>, transform_indices = @transform_3, window_bounds = array<i64: 1, 24>}, {pipeline_mode = #tpu.pipeline_mode<synchronous>, transform_indices = @transform_4, window_bounds = array<i64: 8, 8>}, {pipeline_mode = #tpu.pipeline_mode<synchronous>, transform_indices = @transform_5, window_bounds = array<i64: 8, 32>}, {pipeline_mode = #tpu.pipeline_mode<synchronous>, transform_indices = @transform_6, window_bounds = array<i64: 1, 32>}, {pipeline_mode = #tpu.pipeline_mode<synchronous>, transform_indices = @transform_7, window_bounds = array<i64: 32, 8>}, {pipeline_mode = #tpu.pipeline_mode<synchronous>, transform_indices = @transform_8, window_bounds = array<i64: 10, 8>}, {transform_indices = @transform_9, window_bounds = array<i64: 2, 8, 8>}, {transform_indices = @transform_10, window_bounds = array<i64: 2, 4, 8, 8>}]} {
    %c0 = arith.constant 0 : index
    %c0_0 = arith.constant 0 : index
    %c0_1 = arith.constant 0 : index
    %0 = vector.load %arg1[%c0, %c0_0, %c0_1] : memref<2x8x8xf32, #tpu.memory_space<vmem>>, vector<2x8x8xf32>
    %1 = vector.shape_cast %0 : vector<2x8x8xf32> to vector<16x8xf32>
    %c0_2 = arith.constant 0 : index
    %c0_3 = arith.constant 0 : index
    %2 = vector.load %arg3[%c0_2, %c0_3] : memref<8x24xf32, #tpu.memory_space<vmem>>, vector<8x24xf32>
    %cst = arith.constant dense<0.000000e+00> : vector<16x24xf32>
    %3 = tpu.matmul %1, %2, %cst {dimension_numbers = #tpu.dot_dimension_numbers<[1], [0], [0], [1], [0, 0, 1, 1], [], []>} : vector<16x8xf32>, vector<8x24xf32>, vector<16x24xf32> -> vector<16x24xf32>
    %c0_4 = arith.constant 0 : index
    %c0_5 = arith.constant 0 : index
    %4 = vector.load %arg4[%c0_4, %c0_5] : memref<1x24xf32, #tpu.memory_space<vmem>>, vector<1x24xf32>
    %5 = vector.broadcast %4 : vector<1x24xf32> to vector<16x24xf32>
    %6 = arith.addf %3, %5 : vector<16x24xf32>
    %7 = vector.extract_strided_slice %6 {offsets = [0, 0], sizes = [16, 8], strides = [1, 1]} : vector<16x24xf32> to vector<16x8xf32>
    %8 = vector.shape_cast %7 : vector<16x8xf32> to vector<2x8x8xf32>
    %9 = vector.extract_strided_slice %6 {offsets = [0, 8], sizes = [16, 8], strides = [1, 1]} : vector<16x24xf32> to vector<16x8xf32>
    %10 = vector.shape_cast %9 : vector<16x8xf32> to vector<2x8x8xf32>
    %11 = vector.extract_strided_slice %6 {offsets = [0, 16], sizes = [16, 8], strides = [1, 1]} : vector<16x24xf32> to vector<16x8xf32>
    %12 = vector.shape_cast %11 : vector<16x8xf32> to vector<2x8x8xf32>
    %c6 = arith.constant 6 : index
    %c0_6 = arith.constant 0 : index
    %13 = vector.load %arg9[%c6, %c0_6] : memref<10x8xf32, #tpu.memory_space<vmem>>, vector<4x8xf32>
    %14 = vector.shape_cast %8 : vector<2x8x8xf32> to vector<2x1x8x8xf32>
    %15 = vector.shape_cast %13 : vector<4x8xf32> to vector<1x4x1x8xf32>
    %16 = vector.broadcast %14 : vector<2x1x8x8xf32> to vector<2x4x8x8xf32>
    %17 = vector.broadcast %15 : vector<1x4x1x8xf32> to vector<2x4x8x8xf32>
    %18 = arith.mulf %16, %17 : vector<2x4x8x8xf32>
    %19 = vector.shape_cast %18 : vector<2x4x8x8xf32> to vector<2x32x8xf32>
    "tpu.trace_start"() <{level = 10 : i32, message = "bmd,bkd->bmk"}> : () -> ()
    %cst_7 = arith.constant dense<0.000000e+00> : vector<2x32x8xf32>
    %20 = tpu.matmul %19, %10, %cst_7 {dimension_numbers = #tpu.dot_dimension_numbers<[2], [2], [1], [1], [0, 0, 0, 1, 1, 1], [0], [0]>} : vector<2x32x8xf32>, vector<2x8x8xf32>, vector<2x32x8xf32> -> vector<2x32x8xf32>
    "tpu.trace_stop"() : () -> ()
    %cst_8 = arith.constant 0.707106769 : f32
    %21 = vector.broadcast %cst_8 : f32 to vector<2x32x8xf32>
    %22 = arith.mulf %20, %21 : vector<2x32x8xf32>
    %c0_9 = arith.constant 0 : index
    %c0_10 = arith.constant 0 : index
    %c0_11 = arith.constant 0 : index
    %23 = vector.load %arg2[%c0_9, %c0_10, %c0_11] : memref<2x1x8xf32, #tpu.memory_space<vmem>>, vector<2x1x8xf32>
    %cst_12 = arith.constant 0.000000e+00 : f32
    %24 = vector.broadcast %cst_12 : f32 to vector<2x1x8xf32>
    %25 = arith.cmpf oeq, %23, %24 : vector<2x1x8xf32>
    %cst_13 = arith.constant -1.000000e+10 : f32
    %26 = vector.shape_cast %25 : vector<2x1x8xi1> to vector<2x1x8xi1>
    %27 = vector.broadcast %26 : vector<2x1x8xi1> to vector<2x32x8xi1>
    %28 = vector.broadcast %cst_13 : f32 to vector<2x32x8xf32>
    %29 = arith.select %27, %28, %22 : vector<2x32x8xi1>, vector<2x32x8xf32>
    %cst_14 = arith.constant dense<0xFF800000> : vector<2x32xf32>
    %30 = vector.multi_reduction <maximumf>, %29, %cst_14 [2] : vector<2x32x8xf32> to vector<2x32xf32>
    %31 = vector.shape_cast %30 : vector<2x32xf32> to vector<2x32x1xf32>
    %32 = vector.broadcast %31 : vector<2x32x1xf32> to vector<2x32x8xf32>
    %33 = arith.subf %29, %32 : vector<2x32x8xf32>
    %34 = math.exp %33 : vector<2x32x8xf32>
    %cst_15 = arith.constant dense<0.000000e+00> : vector<2x32xf32>
    %35 = vector.multi_reduction <add>, %34, %cst_15 [2] : vector<2x32x8xf32> to vector<2x32xf32>
    %36 = vector.shape_cast %35 : vector<2x32xf32> to vector<2x32x1xf32>
    %37 = tpu.reciprocal %36 {approx = true} : vector<2x32x1xf32> -> vector<2x32x1xf32>
    %38 = vector.broadcast %37 : vector<2x32x1xf32> to vector<2x32x8xf32>
    %39 = arith.mulf %34, %38 : vector<2x32x8xf32>
    %40 = vector.shape_cast %39 : vector<2x32x8xf32> to vector<2x4x8x8xf32>
    %c0_16 = arith.constant 0 : index
    %c0_17 = arith.constant 0 : index
    %c0_18 = arith.constant 0 : index
    %c0_19 = arith.constant 0 : index
    %41 = vector.load %arg11[%c0_16, %c0_17, %c0_18, %c0_19] : memref<2x4x8x8xf32, #tpu.memory_space<vmem>>, vector<2x4x8x8xf32>
    tpu.vector_store %arg11[%c0_16, %c0_17, %c0_18, %c0_19], %40 {strides = array<i32>} : memref<2x4x8x8xf32, #tpu.memory_space<vmem>>, vector<2x4x8x8xf32>,
    "tpu.trace_start"() <{level = 10 : i32, message = "bmk,bkd->bmd"}> : () -> ()
    %cst_20 = arith.constant dense<0.000000e+00> : vector<2x32x8xf32>
    %42 = tpu.matmul %39, %12, %cst_20 {dimension_numbers = #tpu.dot_dimension_numbers<[2], [1], [1], [2], [0, 0, 0, 1, 1, 2], [0], [0]>} : vector<2x32x8xf32>, vector<2x8x8xf32>, vector<2x32x8xf32> -> vector<2x32x8xf32>
    "tpu.trace_stop"() : () -> ()
    %43 = vector.shape_cast %42 : vector<2x32x8xf32> to vector<2x4x8x8xf32>
    %44 = vector.shape_cast %13 : vector<4x8xf32> to vector<1x4x1x8xf32>
    %45 = vector.broadcast %44 : vector<1x4x1x8xf32> to vector<2x4x8x8xf32>
    %46 = arith.mulf %43, %45 : vector<2x4x8x8xf32>
    %cst_21 = arith.constant dense<0.000000e+00> : vector<2x8x8xf32>
    %47 = vector.multi_reduction <add>, %46, %cst_21 [1] : vector<2x4x8x8xf32> to vector<2x8x8xf32>
    %48 = vector.shape_cast %47 : vector<2x8x8xf32> to vector<16x8xf32>
    %c0_22 = arith.constant 0 : index
    %c0_23 = arith.constant 0 : index
    %49 = vector.load %arg5[%c0_22, %c0_23] : memref<8x8xf32, #tpu.memory_space<vmem>>, vector<8x8xf32>
    %cst_24 = arith.constant dense<0.000000e+00> : vector<16x8xf32>
    %50 = tpu.matmul %48, %49, %cst_24 {dimension_numbers = #tpu.dot_dimension_numbers<[1], [0], [0], [1], [0, 0, 1, 1], [], []>} : vector<16x8xf32>, vector<8x8xf32>, vector<16x8xf32> -> vector<16x8xf32>
    %c0_25 = arith.constant 0 : index
    %c0_26 = arith.constant 0 : index
    %51 = vector.load %arg9[%c0_25, %c0_26] : memref<10x8xf32, #tpu.memory_space<vmem>>, vector<1x8xf32>
    %52 = vector.broadcast %51 : vector<1x8xf32> to vector<16x8xf32>
    %53 = arith.addf %50, %52 : vector<16x8xf32>
    %54 = arith.addf %1, %53 : vector<16x8xf32>
    %cst_27 = arith.constant dense<0.000000e+00> : vector<16xf32>
    %55 = vector.multi_reduction <add>, %54, %cst_27 [1] : vector<16x8xf32> to vector<16xf32>
    %56 = vector.shape_cast %55 : vector<16xf32> to vector<16x1xf32>
    %cst_28 = arith.constant 8.000000e+00 : f32
    %57 = vector.broadcast %cst_28 : f32 to vector<16x1xf32>
    %58 = arith.divf %56, %57 : vector<16x1xf32>
    %59 = vector.broadcast %58 : vector<16x1xf32> to vector<16x8xf32>
    %60 = arith.subf %54, %59 : vector<16x8xf32>
    %61 = arith.mulf %60, %60 : vector<16x8xf32>
    %cst_29 = arith.constant dense<0.000000e+00> : vector<16xf32>
    %62 = vector.multi_reduction <add>, %61, %cst_29 [1] : vector<16x8xf32> to vector<16xf32>
    %63 = vector.shape_cast %62 : vector<16xf32> to vector<16x1xf32>
    %cst_30 = arith.constant 8.000000e+00 : f32
    %64 = vector.broadcast %cst_30 : f32 to vector<16x1xf32>
    %65 = arith.divf %63, %64 : vector<16x1xf32>
    %66 = vector.broadcast %58 : vector<16x1xf32> to vector<16x8xf32>
    %67 = arith.subf %54, %66 : vector<16x8xf32>
    %cst_31 = arith.constant 9.99999974E-6 : f32
    %68 = vector.broadcast %cst_31 : f32 to vector<16x1xf32>
    %69 = arith.addf %65, %68 : vector<16x1xf32>
    %70 = math.rsqrt %69 : vector<16x1xf32>
    %71 = vector.broadcast %70 : vector<16x1xf32> to vector<16x8xf32>
    %72 = arith.mulf %67, %71 : vector<16x8xf32>
    %c2 = arith.constant 2 : index
    %c0_32 = arith.constant 0 : index
    %73 = vector.load %arg9[%c2, %c0_32] : memref<10x8xf32, #tpu.memory_space<vmem>>, vector<1x8xf32>
    %74 = vector.broadcast %73 : vector<1x8xf32> to vector<16x8xf32>
    %75 = arith.mulf %72, %74 : vector<16x8xf32>
    %c3 = arith.constant 3 : index
    %c0_33 = arith.constant 0 : index
    %76 = vector.load %arg9[%c3, %c0_33] : memref<10x8xf32, #tpu.memory_space<vmem>>, vector<1x8xf32>
    %77 = vector.broadcast %76 : vector<1x8xf32> to vector<16x8xf32>
    %78 = arith.addf %75, %77 : vector<16x8xf32>
    %c0_34 = arith.constant 0 : index
    %c0_35 = arith.constant 0 : index
    %79 = vector.load %arg6[%c0_34, %c0_35] : memref<8x32xf32, #tpu.memory_space<vmem>>, vector<8x32xf32>
    %cst_36 = arith.constant dense<0.000000e+00> : vector<16x32xf32>
    %80 = tpu.matmul %78, %79, %cst_36 {dimension_numbers = #tpu.dot_dimension_numbers<[1], [0], [0], [1], [0, 0, 1, 1], [], []>} : vector<16x8xf32>, vector<8x32xf32>, vector<16x32xf32> -> vector<16x32xf32>
    %c0_37 = arith.constant 0 : index
    %c0_38 = arith.constant 0 : index
    %81 = vector.load %arg7[%c0_37, %c0_38] : memref<1x32xf32, #tpu.memory_space<vmem>>, vector<1x32xf32>
    %82 = vector.broadcast %81 : vector<1x32xf32> to vector<16x32xf32>
    %83 = arith.addf %80, %82 : vector<16x32xf32>
    %cst_39 = arith.constant 0.000000e+00 : f32
    %84 = vector.broadcast %cst_39 : f32 to vector<16x32xf32>
    %85 = arith.maximumf %83, %84 : vector<16x32xf32>
    %c0_40 = arith.constant 0 : index
    %c0_41 = arith.constant 0 : index
    %86 = vector.load %arg8[%c0_40, %c0_41] : memref<32x8xf32, #tpu.memory_space<vmem>>, vector<32x8xf32>
    %cst_42 = arith.constant dense<0.000000e+00> : vector<16x8xf32>
    %87 = tpu.matmul %85, %86, %cst_42 {dimension_numbers = #tpu.dot_dimension_numbers<[1], [0], [0], [1], [0, 0, 1, 1], [], []>} : vector<16x32xf32>, vector<32x8xf32>, vector<16x8xf32> -> vector<16x8xf32>
    %c1 = arith.constant 1 : index
    %c0_43 = arith.constant 0 : index
    %88 = vector.load %arg9[%c1, %c0_43] : memref<10x8xf32, #tpu.memory_space<vmem>>, vector<1x8xf32>
    %89 = vector.broadcast %88 : vector<1x8xf32> to vector<16x8xf32>
    %90 = arith.addf %87, %89 : vector<16x8xf32>
    %91 = arith.addf %78, %90 : vector<16x8xf32>
    %cst_44 = arith.constant dense<0.000000e+00> : vector<16xf32>
    %92 = vector.multi_reduction <add>, %91, %cst_44 [1] : vector<16x8xf32> to vector<16xf32>
    %93 = vector.shape_cast %92 : vector<16xf32> to vector<16x1xf32>
    %cst_45 = arith.constant 8.000000e+00 : f32
    %94 = vector.broadcast %cst_45 : f32 to vector<16x1xf32>
    %95 = arith.divf %93, %94 : vector<16x1xf32>
    %96 = vector.broadcast %95 : vector<16x1xf32> to vector<16x8xf32>
    %97 = arith.subf %91, %96 : vector<16x8xf32>
    %98 = arith.mulf %97, %97 : vector<16x8xf32>
    %cst_46 = arith.constant dense<0.000000e+00> : vector<16xf32>
    %99 = vector.multi_reduction <add>, %98, %cst_46 [1] : vector<16x8xf32> to vector<16xf32>
    %100 = vector.shape_cast %99 : vector<16xf32> to vector<16x1xf32>
    %cst_47 = arith.constant 8.000000e+00 : f32
    %101 = vector.broadcast %cst_47 : f32 to vector<16x1xf32>
    %102 = arith.divf %100, %101 : vector<16x1xf32>
    %103 = vector.broadcast %95 : vector<16x1xf32> to vector<16x8xf32>
    %104 = arith.subf %91, %103 : vector<16x8xf32>
    %cst_48 = arith.constant 9.99999974E-6 : f32
    %105 = vector.broadcast %cst_48 : f32 to vector<16x1xf32>
    %106 = arith.addf %102, %105 : vector<16x1xf32>
    %107 = math.rsqrt %106 : vector<16x1xf32>
    %108 = vector.broadcast %107 : vector<16x1xf32> to vector<16x8xf32>
    %109 = arith.mulf %104, %108 : vector<16x8xf32>
    %c4 = arith.constant 4 : index
    %c0_49 = arith.constant 0 : index
    %110 = vector.load %arg9[%c4, %c0_49] : memref<10x8xf32, #tpu.memory_space<vmem>>, vector<1x8xf32>
    %111 = vector.broadcast %110 : vector<1x8xf32> to vector<16x8xf32>
    %112 = arith.mulf %109, %111 : vector<16x8xf32>
    %c5 = arith.constant 5 : index
    %c0_50 = arith.constant 0 : index
    %113 = vector.load %arg9[%c5, %c0_50] : memref<10x8xf32, #tpu.memory_space<vmem>>, vector<1x8xf32>
    %114 = vector.broadcast %113 : vector<1x8xf32> to vector<16x8xf32>
    %115 = arith.addf %112, %114 : vector<16x8xf32>
    %116 = vector.shape_cast %115 : vector<16x8xf32> to vector<2x8x8xf32>
    %c0_51 = arith.constant 0 : index
    %c0_52 = arith.constant 0 : index
    %c0_53 = arith.constant 0 : index
    %117 = vector.load %arg10[%c0_51, %c0_52, %c0_53] : memref<2x8x8xf32, #tpu.memory_space<vmem>>, vector<2x8x8xf32>
    tpu.vector_store %arg10[%c0_51, %c0_52, %c0_53], %116 {strides = array<i32>} : memref<2x8x8xf32, #tpu.memory_space<vmem>>, vector<2x8x8xf32>,
    return
  }
  func.func @transform_0(%arg0: i32) -> (i32, i32, i32) {
    %c0_i32 = arith.constant 0 : i32
    %c0_i32_0 = arith.constant 0 : i32
    %c0_i32_1 = arith.constant 0 : i32
    return %arg0, %c0_i32, %c0_i32_0 : i32, i32, i32
  }
  func.func @transform_1(%arg0: i32) -> (i32, i32, i32) {
    %c0_i32 = arith.constant 0 : i32
    %c0_i32_0 = arith.constant 0 : i32
    %c0_i32_1 = arith.constant 0 : i32
    return %arg0, %c0_i32, %c0_i32_0 : i32, i32, i32
  }
  func.func @transform_2(%arg0: i32) -> (i32, i32) {
    %c0_i32 = arith.constant 0 : i32
    %c0_i32_0 = arith.constant 0 : i32
    %c0_i32_1 = arith.constant 0 : i32
    return %c0_i32, %c0_i32_0 : i32, i32
  }
  func.func @transform_3(%arg0: i32) -> (i32, i32) {
    %c0_i32 = arith.constant 0 : i32
    %c0_i32_0 = arith.constant 0 : i32
    %c0_i32_1 = arith.constant 0 : i32
    return %c0_i32, %c0_i32_0 : i32, i32
  }
  func.func @transform_4(%arg0: i32) -> (i32, i32) {
    %c0_i32 = arith.constant 0 : i32
    %c0_i32_0 = arith.constant 0 : i32
    %c0_i32_1 = arith.constant 0 : i32
    return %c0_i32, %c0_i32_0 : i32, i32
  }
  func.func @transform_5(%arg0: i32) -> (i32, i32) {
    %c0_i32 = arith.constant 0 : i32
    %c0_i32_0 = arith.constant 0 : i32
    %c0_i32_1 = arith.constant 0 : i32
    return %c0_i32, %c0_i32_0 : i32, i32
  }
  func.func @transform_6(%arg0: i32) -> (i32, i32) {
    %c0_i32 = arith.constant 0 : i32
    %c0_i32_0 = arith.constant 0 : i32
    %c0_i32_1 = arith.constant 0 : i32
    return %c0_i32, %c0_i32_0 : i32, i32
  }
  func.func @transform_7(%arg0: i32) -> (i32, i32) {
    %c0_i32 = arith.constant 0 : i32
    %c0_i32_0 = arith.constant 0 : i32
    %c0_i32_1 = arith.constant 0 : i32
    return %c0_i32, %c0_i32_0 : i32, i32
  }
  func.func @transform_8(%arg0: i32) -> (i32, i32) {
    %c0_i32 = arith.constant 0 : i32
    %c0_i32_0 = arith.constant 0 : i32
    %c0_i32_1 = arith.constant 0 : i32
    return %c0_i32, %c0_i32_0 : i32, i32
  }
  func.func @transform_9(%arg0: i32) -> (i32, i32, i32) {
    %c0_i32 = arith.constant 0 : i32
    %c0_i32_0 = arith.constant 0 : i32
    %c0_i32_1 = arith.constant 0 : i32
    return %arg0, %c0_i32, %c0_i32_0 : i32, i32, i32
  }
  func.func @transform_10(%arg0: i32) -> (i32, i32, i32, i32) {
    %c0_i32 = arith.constant 0 : i32
    %c0_i32_0 = arith.constant 0 : i32
    %c0_i32_1 = arith.constant 0 : i32
    %c0_i32_2 = arith.constant 0 : i32
    return %arg0, %c0_i32, %c0_i32_0, %c0_i32_1 : i32, i32, i32, i32
  }
}

</mosaic_0001>

<bundles_post_ra>
// kernel: tpu_custom_call.1
= control target key start
LH: loop header
LB: loop body
LE: loop exit
PB: predicated region body
PF: predicated region fallthrough
CT: control target
= control target key end

     0   :  { %16 = vsyncpa [#allocation3], 0  ;;  %vm46_vm0 = vcmask 64512   ;;  %s1623_s0 = inlined_call_operand.vmem [shape: f32[2,8,8], index: 0, kind: input, shape index: {}]   ;;  %s1624_s1 = inlined_call_operand.vmem [shape: f32[2,1,8], index: 1, kind: input, shape index: {}]   ;;  %s1625_s2 = inlined_call_operand.vmem [shape: f32[8,24], index: 2, kind: input, shape index: {}]   ;;  %s1626_s3 = inlined_call_operand.vmem [shape: f32[1,24], index: 3, kind: input, shape index: {}]   ;;  %s1627_s4 = inlined_call_operand.vmem [shape: f32[8,8], index: 4, kind: input, shape index: {}]   ;;  %s1628_s5 = inlined_call_operand.vmem [shape: f32[8,32], index: 5, kind: input, shape index: {}]   ;;  %s1629_s6 = inlined_call_operand.vmem [shape: f32[1,32], index: 6, kind: input, shape index: {}]   ;;  %s1630_s7 = inlined_call_operand.vmem [shape: f32[32,8], index: 7, kind: input, shape index: {}]   ;;  %s1631_s8 = inlined_call_operand.vmem [shape: f32[10,8], index: 8, kind: input, shape index: {}]   ;;  %s1632_s9 = inlined_call_operand.hbm [shape: f32[2,8,8], index: 9, kind: output, shape index: {0}]   ;;  %s1633_s10 = inlined_call_operand.hbm [shape: f32[2,4,8,8], index: 10, kind: output, shape index: {1}]  }
   0x1   :  { %v38_v0 = vld [vmem:[%s1625_s2] sm:$0xff]  ;;  %v1420_v2 = vld [vmem:[%s1623_s0 + $0x8] sm:$0xff] }
   0x2   :  { %v1415_v1 = vld [vmem:[%s1623_s0] sm:$0xff]  ;;  %1194 = vmatprep.subr.mxu0 %v38_v0 }
   0x3   :  { %1196 = vmatprep.mubr.msk.f32.mxu0 %vm46_vm0, %v1415_v1 }
   0x4   :  { %17 = vsyncpa [#allocation5], 0  ;;  %1195 = vmatpush3.msra.mxu0 %v38_v0  ;;  %v1346_v3 = vmov 1966171168   ;;  %v141_v5 = vlaneseq  ;;  %v1124_v16 = vld [vmem:[%s1626_s3] ss:$0 sm:$0xff] }
   0x5   :  { %1197 = vmatmul.mubr.msk.f32.vlgmr.msra.gmra.mxu0 %vm46_vm0, %v1420_v2  ;;  %v139_v4 = vunpack.c.l.s4 %v1346_v3  ;;  %v1127_v8 = vld.sshfl [vmem:[%s1631_s8 + $0x6] sm:$0x33 pattern:$0x75316420]  ;;  %s1347_s21 = smov 120   ;;  %v1348_v36 = vmov 0  }
   0x6   :  { %v142_v7 = vshrl.u32 %v141_v5, 7  ;;  %v137_v9 = vcombine.high %v1127_v8, %v1127_v8  ;;  %v394_v35 = vld [vmem:[%s1624_s1] sm:$0x1]  ;;  %v395_v38 = vld [vmem:[%s1624_s1 + $0x1] sm:$0x1]  ;;  %s1349_s1 = smov 112  }
   0x7   :  { %v140_v6 = vunpack.c.0.s8 %v139_v4  ;;  %vm396_vm1 = vcmp.eq.f32.partialorder %v394_v35, 0.0  ;;  %vm397_vm2 = vcmp.eq.f32.partialorder %v395_v38, 0.0  ;;  %vm966_vm5 = vcmask 261120  }
   0x8   :  { %v156_v13 = vsub.s32 0, %v142_v7  ;;  %v398_v37 = vsel %vm396_vm1, 1, %v1348_v36  ;;  %v399_v40 = vsel %vm397_vm2, 1, %v1348_v36 }
   0x9   :  { %v143_v10 = vsub.s32 %v140_v6, %v142_v7 }
   0xa   :  { %v403_v39 = vrot.slane %v398_v37, %v156_v13  ;;  %v407_v46 = vrot.slane %v399_v40, %v156_v13 }
   0xb   :  { %v151_v11 = vrot.slane %v137_v9, %v143_v10  ;;  %v144_v12 = vrot.slane %v1127_v8, %v143_v10 }
   0xc   :  { %vm1482_vm3 = vcmp.eq.s32.totalorder %v403_v39, 1  ;;  %vm1491_vm4 = vcmp.eq.s32.totalorder %v407_v46, 1 }
   0xd   :  { %v152_v14 = vcombine.high %v144_v12, %v144_v12  ;;  %v1434_v19 = vrot.slane %v144_v12, %v156_v13  ;;  %v153_v24 = vcombine.high %v151_v11, %v151_v11  ;;  %v1450_v26 = vrot.slane %v151_v11, %v156_v13 }
   0xf   :  { %v1436_v20 = vrot.slane %v152_v14, %v156_v13  ;;  %v1452_v27 = vrot.slane %v153_v24, %v156_v13 }
  0xc5   :  { %v1198_v15 = vpop.f32.mrf.mxu0 }
  0xc6   :  { %v1443_v23 = vadd.f32 %v1198_v15, %v1124_v16 }
  0xc7   :  { %v119_v17 = vpop.f32.mrf.mxu0 }
  0xc8   :  { %v1432_v18 = vadd.f32 %v1124_v16, %v119_v17  ;;  %v178_v31 = vmul.f32 %v1434_v19, %v1443_v23  ;;  %v179_v32 = vmul.f32 %v1450_v26, %v1443_v23  ;;  %v180_v33 = vmul.f32 %v1436_v20, %v1443_v23 }
  0xc9   :  { %v181_v34 = vmul.f32 %v1452_v27, %v1443_v23 }
  0xca   :  { %183 = vrot.lane.b32.xlu0 %v1432_v18, %s1347_s21  ;;  %v174_v21 = vmul.f32 %v1434_v19, %v1432_v18  ;;  %v176_v22 = vmul.f32 %v1436_v20, %v1432_v18  ;;  %v175_v28 = vmul.f32 %v1450_v26, %v1432_v18  ;;  %v177_v29 = vmul.f32 %v1452_v27, %v1432_v18 }
  0xcc   :  { %1201 = vmatprep.mubr.msk.f32.mxu0 %vm46_vm0, %v174_v21  ;;  %1204 = vmatprep.mubr.msk.f32.mxu1 %vm46_vm0, %v176_v22 }
  0xce   :  { %285 = vrot.lane.b32.xlu0 %v1443_v23, %s1347_s21 }
 0x13c   :  { %v184_v25 = vpop.permute.xlu0 %183 }
 0x13d   :  { %1199 = vmatprep.subr.msk.mxu0 %vm46_vm0, %v184_v25  ;;  %1252 = vmatprep.subr.msk.mxu1 %vm46_vm0, %v184_v25 }
 0x13e   :  { %1200 = vmatpush3.xpose.msk.msra.mxu0 %vm46_vm0, %v184_v25  ;;  %1253 = vmatpush3.xpose.msk.msra.mxu1 %vm46_vm0, %v184_v25 }
 0x140   :  { %v286_v30 = vpop.permute.xlu0 %285 }
 0x141   :  { %1202 = vmatmul.mubr.msk.f32.vlgmr.msra.gmra.mxu0 %vm46_vm0, %v175_v28  ;;  %1205 = vmatmul.mubr.msk.f32.vlgmr.msra.gmra.mxu1 %vm46_vm0, %v177_v29 }
 0x142   :  { %1207 = vmatprep.subr.msk.mxu0 %vm46_vm0, %v286_v30  ;;  %1209 = vmatprep.mubr.msk.f32.mxu0 %vm46_vm0, %v178_v31 }
 0x143   :  { %1208 = vmatpush3.xpose.msk.msra.mxu0 %vm46_vm0, %v286_v30 }
 0x146   :  { %1210 = vmatmul.mubr.msk.f32.vlgmr.msra.gmra.mxu0 %vm46_vm0, %v179_v32 }
 0x147   :  { %1212 = vmatprep.mubr.msk.f32.mxu0 %vm46_vm0, %v180_v33 }
 0x14a   :  { %1213 = vmatmul.mubr.msk.f32.gmra.mxu0 %vm46_vm0, %v181_v34 }
 0x201   :  { %v1203_v41 = vpop.f32.mrf.mxu0  ;;  %v1206_v44 = vpop.f32.mrf.mxu1 }
 0x202   :  { %v387_v43 = vmul.f32 0.70710677, %v1203_v41  ;;  %v389_v0 = vmul.f32 0.70710677, %v1206_v44 }
 0x203   :  { %v265_v45 = vpop.f32.mrf.mxu0  ;;  %v275_v52 = vpop.f32.mrf.mxu1 }
 0x204   :  { %v386_v47 = vmul.f32 0.70710677, %v265_v45  ;;  %v411_v48 = vsel %vm1482_vm3, -1e+10, %v387_v43  ;;  %v388_v58 = vmul.f32 0.70710677, %v275_v52 }
 0x205   :  { %v421_v49 = vsel %vm46_vm0, %v411_v48, -inf  ;;  %v413_v7 = vsel %vm1482_vm3, -1e+10, %v389_v0 }
 0x206   :  { %v1211_v50 = vpop.f32.mrf.mxu0  ;;  %422 = vmax.xlane.f32.xlu1 %v421_v49  ;;  %v410_v51 = vsel %vm1482_vm3, -1e+10, %v386_v47  ;;  %v412_v3 = vsel %vm1482_vm3, -1e+10, %v388_v58  ;;  %v427_v8 = vsel %vm46_vm0, %v413_v7, -inf }
 0x207   :  { %v391_v53 = vmul.f32 0.70710677, %v1211_v50  ;;  %v418_v57 = vsel %vm46_vm0, %v410_v51, -inf  ;;  %v424_v5 = vsel %vm46_vm0, %v412_v3, -inf }
 0x208   :  { %v367_v55 = vpop.f32.mrf.mxu0 }
 0x209   :  { %v390_v56 = vmul.f32 0.70710677, %v367_v55  ;;  %v415_v59 = vsel %vm1491_vm4, -1e+10, %v391_v53 }
 0x20a   :  { %419 = vmax.xlane.f32.xlu1 %v418_v57  ;;  %v1214_v60 = vpop.f32.mrf.mxu0  ;;  %v433_v63 = vsel %vm46_vm0, %v415_v59, -inf }
 0x20b   :  { %v414_v61 = vsel %vm1491_vm4, -1e+10, %v390_v56  ;;  %v393_v9 = vmul.f32 0.70710677, %v1214_v60 }
 0x20c   :  { %v430_v62 = vsel %vm46_vm0, %v414_v61, -inf  ;;  %v377_v4 = vpop.f32.mrf.mxu0 }
 0x20d   :  { %431 = vmax.xlane.f32.xlu0 %v430_v62  ;;  %v392_v6 = vmul.f32 0.70710677, %v377_v4  ;;  %v417_v12 = vsel %vm1491_vm4, -1e+10, %v393_v9 }
 0x20e   :  { %434 = vmax.xlane.f32.xlu1 %v433_v63  ;;  %v439_v13 = vsel %vm46_vm0, %v417_v12, -inf }
 0x20f   :  { %v416_v10 = vsel %vm1491_vm4, -1e+10, %v392_v6 }
 0x210   :  { %v436_v11 = vsel %vm46_vm0, %v416_v10, -inf }
 0x212   :  { %425 = vmax.xlane.f32.xlu1 %v424_v5 }
 0x216   :  { %428 = vmax.xlane.f32.xlu1 %v427_v8 }
 0x21a   :  { %437 = vmax.xlane.f32.xlu1 %v436_v11 }
 0x21e   :  { %440 = vmax.xlane.f32.xlu1 %v439_v13 }
 0x28f   :  { %v423_v14 = vpop.xlane.xlu1 %422 }
 0x290   :  { %v443_v15 = vsub.f32 %v411_v48, %v423_v14 }
 0x292   :  { %v452_v16 = vmul.f32 1.442695, %v443_v15 }
 0x293   :  { %v420_v17 = vpop.xlane.xlu1 %419 }
 0x294   :  { %1262 = vpow2.f32 %v452_v16  ;;  %v442_v21 = vsub.f32 %v410_v51, %v420_v17 }
 0x296   :  { %v450_v22 = vmul.f32 1.442695, %v442_v21  ;;  %v432_v24 = vpop.xlane.xlu0 %431 }
 0x297   :  { %v435_v25 = vpop.xlane.xlu1 %434  ;;  %v446_v28 = vsub.f32 %v414_v61, %v432_v24 }
 0x298   :  { %1264 = vpow2.f32 %v450_v22  ;;  %v447_v32 = vsub.f32 %v415_v59, %v435_v25 }
 0x299   :  { %v458_v31 = vmul.f32 1.442695, %v446_v28  ;;  %v736_v28 = vld [vmem:[%s1627_s4] sm:$0xff] }
 0x29a   :  { %v460_v37 = vmul.f32 1.442695, %v447_v32 }
 0x29b   :  { %v426_v29 = vpop.xlane.xlu1 %425 }
 0x29c   :  { %v444_v30 = vsub.f32 %v412_v3, %v426_v29 }
 0x29e   :  { %v454_v33 = vmul.f32 1.442695, %v444_v30 }
 0x29f   :  { %v429_v34 = vpop.xlane.xlu1 %428 }
 0x2a0   :  { %1266 = vpow2.f32 %v454_v33  ;;  %v445_v35 = vsub.f32 %v413_v7, %v429_v34 }
 0x2a1   :  { %v1263_v36 = vpop.eup %1262  ;;  %1268 = vpow2.f32 %v458_v31 }
 0x2a2   :  { %v456_v38 = vmul.f32 1.442695, %v445_v35  ;;  %v469_v39 = vsel %vm46_vm0, %v1263_v36, 0.0 }
 0x2a3   :  { %470 = vadd.xlane.f32.xlu1 %v469_v39  ;;  %v438_v40 = vpop.xlane.xlu1 %437 }
 0x2a4   :  { %1270 = vpow2.f32 %v456_v38  ;;  %v448_v41 = vsub.f32 %v416_v10, %v438_v40 }
 0x2a5   :  { %v1265_v42 = vpop.eup %1264  ;;  %1272 = vpow2.f32 %v460_v37 }
 0x2a6   :  { %v462_v43 = vmul.f32 1.442695, %v448_v41  ;;  %v466_v44 = vsel %vm46_vm0, %v1265_v42, 0.0 }
 0x2a7   :  { %467 = vadd.xlane.f32.xlu1 %v466_v44  ;;  %v441_v45 = vpop.xlane.xlu1 %440 }
 0x2a8   :  { %1274 = vpow2.f32 %v462_v43  ;;  %v449_v46 = vsub.f32 %v417_v12, %v441_v45 }
 0x2aa   :  { %v464_v47 = vmul.f32 1.442695, %v449_v46 }
 0x2ac   :  { %1276 = vpow2.f32 %v464_v47 }
 0x2ad   :  { %v1267_v48 = vpop.eup %1266 }
 0x2ae   :  { %v472_v49 = vsel %vm46_vm0, %v1267_v48, 0.0  ;;  %v1269_v50 = vpop.eup %1268 }
 0x2af   :  { %473 = vadd.xlane.f32.xlu1 %v472_v49  ;;  %v478_v53 = vsel %vm46_vm0, %v1269_v50, 0.0 }
 0x2b1   :  { %v1271_v51 = vpop.eup %1270 }
 0x2b2   :  { %v475_v52 = vsel %vm46_vm0, %v1271_v51, 0.0  ;;  %v1273_v54 = vpop.eup %1272 }
 0x2b3   :  { %476 = vadd.xlane.f32.xlu0 %v475_v52  ;;  %479 = vadd.xlane.f32.xlu1 %v478_v53  ;;  %v481_v56 = vsel %vm46_vm0, %v1273_v54, 0.0 }
 0x2b5   :  { %v1275_v55 = vpop.eup %1274 }
 0x2b6   :  { %v484_v57 = vsel %vm46_vm0, %v1275_v55, 0.0 }
 0x2b7   :  { %482 = vadd.xlane.f32.xlu0 %v481_v56  ;;  %485 = vadd.xlane.f32.xlu1 %v484_v57  ;;  %v1146_v57 = vld [vmem:[%s1631_s8] ss:$0 sm:$0xff] }
 0x2b9   :  { %v1277_v58 = vpop.eup %1276 }
 0x2ba   :  { %v487_v59 = vsel %vm46_vm0, %v1277_v58, 0.0 }
 0x2bb   :  { %488 = vadd.xlane.f32.xlu0 %v487_v59 }
 0x2c8   :  { %514 = vrot.lane.b32.xlu1 %v1432_v18, %s1349_s1 }
 0x2d1   :  { %614 = vrot.lane.b32.xlu0 %v1443_v23, %s1349_s1 }
 0x32c   :  { %v471_v60 = vpop.xlane.xlu1 %470 }
 0x32d   :  { %1278 = vrcp.f32 %v471_v60 }
 0x330   :  { %v468_v61 = vpop.xlane.xlu1 %467 }
 0x331   :  { %1280 = vrcp.f32 %v468_v61 }
 0x338   :  { %v474_v62 = vpop.xlane.xlu1 %473 }
 0x339   :  { %1282 = vrcp.f32 %v474_v62 }
 0x33a   :  { %v1279_v63 = vpop.eup %1278 }
 0x33b   :  { %v499_v0 = vmul.f32 %v1279_v63, %v1263_v36 }
 0x33c   :  { %v477_v3 = vpop.xlane.xlu0 %476  ;;  %v480_v4 = vpop.xlane.xlu1 %479 }
 0x33d   :  { %1284 = vrcp.f32 %v477_v3  ;;  %507 = vst.msk [vmem:[#allocation4 + $0x8] sm:$0xff] %vm46_vm0, %v499_v0 }
 0x33e   :  { %v1281_v5 = vpop.eup %1280  ;;  %1286 = vrcp.f32 %v480_v4 }
 0x33f   :  { %v498_v6 = vmul.f32 %v1281_v5, %v1265_v42 }
 0x340   :  { %v483_v7 = vpop.xlane.xlu0 %482  ;;  %v486_v18 = vpop.xlane.xlu1 %485 }
 0x341   :  { %1288 = vrcp.f32 %v483_v7  ;;  %506 = vst.msk [vmem:[#allocation4] sm:$0xff] %vm46_vm0, %v498_v6  ;;  %1217 = vmatprep.mubr.msk.f32.mxu1 %vm46_vm0, %v498_v6 }
 0x342   :  { %1290 = vrcp.f32 %v486_v18 }
 0x344   :  { %v489_v23 = vpop.xlane.xlu0 %488  ;;  %v515_v8 = vpop.permute.xlu1 %514 }
 0x345   :  { %1292 = vrcp.f32 %v489_v23  ;;  %1215 = vmatprep.subr.mxu1 %v515_v8 }
 0x346   :  { %v1283_v9 = vpop.eup %1282  ;;  %1216 = vmatpush3.msra.mxu1 %v515_v8 }
 0x347   :  { %1218 = vmatmul.mubr.msk.f32.vlgmr.msra.gmra.mxu1 %vm46_vm0, %v499_v0  ;;  %v500_v10 = vmul.f32 %v1283_v9, %v1267_v48  ;;  %1231 = vmatprep.subr.mxu1 %v736_v28 }
 0x348   :  { %v615_v11 = vpop.permute.xlu0 %614  ;;  %1232 = vmatpush3.msra.mxu1 %v736_v28  ;;  %v1150_v28 = vld [vmem:[%s1631_s8 + $0x3] ss:$0 sm:$0xff] }
 0x349   :  { %508 = vst.msk [vmem:[#allocation4 + $0x10] sm:$0xff] %vm46_vm0, %v500_v10  ;;  %1220 = vmatprep.mubr.msk.f32.mxu1 %vm46_vm0, %v500_v10  ;;  %1223 = vmatprep.subr.mxu0 %v615_v11 }
 0x34a   :  { %v1285_v12 = vpop.eup %1284  ;;  %1224 = vmatpush3.msra.mxu0 %v615_v11 }
 0x34b   :  { %v1287_v13 = vpop.eup %1286  ;;  %v501_v14 = vmul.f32 %v1285_v12, %v1271_v51 }
 0x34c   :  { %v502_v15 = vmul.f32 %v1287_v13, %v1269_v50 }
 0x34d   :  { %509 = vst.msk [vmem:[#allocation4 + $0x18] sm:$0xff] %vm46_vm0, %v501_v14  ;;  %1221 = vmatmul.mubr.msk.f32.gmra.mxu1 %vm46_vm0, %v501_v14 }
 0x34e   :  { %v1289_v16 = vpop.eup %1288  ;;  %510 = vst.msk [vmem:[#allocation4 + $0x20] sm:$0xff] %vm46_vm0, %v502_v15  ;;  %1225 = vmatprep.mubr.msk.f32.mxu0 %vm46_vm0, %v502_v15 }
 0x34f   :  { %v1291_v17 = vpop.eup %1290  ;;  %v503_v21 = vmul.f32 %v1289_v16, %v1273_v54 }
 0x350   :  { %v504_v22 = vmul.f32 %v1291_v17, %v1275_v55  ;;  %v1149_v17 = vld [vmem:[%s1631_s8 + $0x2] ss:$0 sm:$0xff] }
 0x351   :  { %511 = vst.msk [vmem:[#allocation4 + $0x28] sm:$0xff] %vm46_vm0, %v503_v21  ;;  %1226 = vmatmul.mubr.msk.f32.vlgmr.msra.gmra.mxu0 %vm46_vm0, %v503_v21 }
 0x352   :  { %v1293_v24 = vpop.eup %1292  ;;  %512 = vst.msk [vmem:[#allocation4 + $0x30] sm:$0xff] %vm46_vm0, %v504_v22  ;;  %1228 = vmatprep.mubr.msk.f32.mxu0 %vm46_vm0, %v504_v22 }
 0x353   :  { %v505_v25 = vmul.f32 %v1293_v24, %v1277_v58 }
 0x355   :  { %513 = vst.msk [vmem:[#allocation4 + $0x38] sm:$0xff] %vm46_vm0, %v505_v25  ;;  %1229 = vmatmul.mubr.msk.f32.gmra.mxu0 %vm46_vm0, %v505_v25 }
 0x407   :  { %v1219_v29 = vpop.f32.mrf.mxu1 }
 0x408   :  { %v715_v32 = vmul.f32 %v1219_v29, %v1450_v26 }
 0x409   :  { %v595_v30 = vpop.f32.mrf.mxu1 }
 0x40a   :  { %v714_v31 = vmul.f32 %v595_v30, %v1434_v19  ;;  %v723_v36 = vsel %vm46_vm0, %v715_v32, 0.0  ;;  %v959_v32 = vld [vmem:[%s1630_s7 + $0x10] sm:$0xff] }
 0x40c   :  { %v722_v34 = vsel %vm46_vm0, %v714_v31, 0.0  ;;  %v960_v31 = vld [vmem:[%s1630_s7 + $0x18] sm:$0xff] }
 0x40d   :  { %v1222_v33 = vpop.f32.mrf.mxu1  ;;  %v724_v39 = vadd.f32 %v723_v36, %v722_v34  ;;  %1241 = vmatprep.subr.mxu1 %v960_v31  ;;  %v957_v34 = vld [vmem:[%s1630_s7] sm:$0xff] }
 0x40e   :  { %v717_v37 = vmul.f32 %v1222_v33, %v1452_v27  ;;  %v958_v33 = vld [vmem:[%s1630_s7 + $0x8] sm:$0xff] }
 0x40f   :  { %v605_v35 = vpop.f32.mrf.mxu1 }
 0x410   :  { %v716_v38 = vmul.f32 %v605_v35, %v1436_v20  ;;  %v727_v44 = vsel %vm46_vm0, %v717_v37, 0.0  ;;  %v1151_v35 = vld [vmem:[%s1629_s6] ss:$0 sm:$0xff]  ;;  %s1350_s6 = smov [#allocation4]  }
 0x411   :  { %v1227_v40 = vpop.f32.mrf.mxu0  ;;  %s1109_s7 = sshll.u32 %s1350_s6, 4  ;;  %s1110_s7 = int_to_ptr.vmem [resolvable:$true] %s1109_s7 }
 0x412   :  { %v725_v41 = vsel %vm46_vm0, %v716_v38, 0.0  ;;  %v719_v45 = vmul.f32 %v1227_v40, %v1450_v26  ;;  %s1302_s22 = scalar_lea.vmem %s1110_s7, 1024  ;;  %p1307_p1 = scmp.lt.s32.totalorder %s1110_s7, %s1110_s7 }
 0x413   :  { %v726_v42 = vadd.f32 %v725_v41, %v724_v39  ;;  %v695_v43 = vpop.f32.mrf.mxu0  ;;  %p1303_p0 = scmp.ne.s32.totalorder %s1110_s7, %s1302_s22  ;;  %p1308_p2 = scmp.lt.s32.totalorder %s1302_s22, %s1302_s22 }
 0x414   :  { %v718_v46 = vmul.f32 %v695_v43, %v1434_v19  ;;  %v730_v51 = vsel %vm46_vm0, %v719_v45, 0.0 }
 0x415   :  { %v728_v47 = vadd.f32 %v727_v44, %v726_v42  ;;  %v1230_v48 = vpop.f32.mrf.mxu0  ;;  %v1154_v42 = vld [vmem:[%s1631_s8 + $0x1] ss:$0 sm:$0xff]  ;;  %p1309_p3 = por %p1308_p2, %p1307_p1 }
 0x416   :  { %v729_v49 = vsel %vm46_vm0, %v718_v46, 0.0  ;;  %v721_v52 = vmul.f32 %v1230_v48, %v1452_v27 }
 0x417   :  { %v705_v50 = vpop.f32.mrf.mxu0  ;;  %1233 = vmatprep.mubr.msk.f32.mxu1 %vm46_vm0, %v728_v47  ;;  %v731_v54 = vadd.f32 %v730_v51, %v729_v49  ;;  %p1310_p4 = pnand %p1309_p3, %p1303_p0 }
 0x418   :  { %v720_v53 = vmul.f32 %v705_v50, %v1436_v20  ;;  %v734_v26 = vsel %vm46_vm0, %v721_v52, 0.0 }
 0x41a   :  { %v732_v55 = vsel %vm46_vm0, %v720_v53, 0.0 }
 0x41b   :  { %v733_v56 = vadd.f32 %v732_v55, %v731_v54 }
 0x41d   :  { %v735_v19 = vadd.f32 %v734_v26, %v733_v56 }
 0x41f   :  { %1234 = vmatmul.mubr.msk.f32.vlgmr.msra.gmra.mxu1 %vm46_vm0, %v735_v19 }
 0x420   :  { %1242 = vmatpush3.msra.mxu1 %v960_v31 }
 0x421   :  { %1243 = vmatprep.subr.mxu1 %v959_v32 }
 0x422   :  { %1244 = vmatpush3.msra.mxu1 %v959_v32 }
 0x423   :  { %1245 = vmatprep.subr.mxu1 %v958_v33 }
 0x424   :  { %1246 = vmatpush3.msra.mxu1 %v958_v33 }
 0x425   :  { %1247 = vmatprep.subr.mxu1 %v957_v34 }
 0x426   :  { %1248 = vmatpush3.msra.mxu1 %v957_v34 }
 0x4df   :  { %v1235_v58 = vpop.f32.mrf.mxu1 }
 0x4e0   :  { %v820_v59 = vadd.f32 %v1235_v58, %v1146_v57 }
 0x4e1   :  { %v814_v60 = vpop.f32.mrf.mxu1 }
 0x4e2   :  { %v815_v61 = vadd.f32 %v1146_v57, %v814_v60  ;;  %v824_v27 = vadd.f32 %v820_v59, %v1420_v2 }
 0x4e4   :  { %v828_v20 = vsel %vm46_vm0, %v824_v27, 0.0  ;;  %v823_v62 = vadd.f32 %v815_v61, %v1415_v1  ;;  %v866_v1 = vld [vmem:[%s1628_s5] sm:$0xff] }
 0x4e5   :  { %829 = vadd.xlane.f32.xlu0 %v828_v20  ;;  %1236 = vmatprep.subr.mxu0 %v866_v1 }
 0x4e6   :  { %v825_v63 = vsel %vm46_vm0, %v823_v62, 0.0  ;;  %1237 = vmatpush3.msra.mxu0 %v866_v1 }
 0x4e7   :  { %826 = vadd.xlane.f32.xlu1 %v825_v63 }
 0x56e   :  { %v830_v0 = vpop.xlane.xlu0 %829 }
 0x56f   :  { %v833_v3 = vmul.f32 0.125, %v830_v0 }
 0x570   :  { %v827_v4 = vpop.xlane.xlu1 %826 }
 0x571   :  { %v835_v5 = vsub.f32 %v824_v27, %v833_v3  ;;  %v832_v6 = vmul.f32 0.125, %v827_v4 }
 0x573   :  { %v834_v7 = vsub.f32 %v823_v62, %v832_v6  ;;  %v837_v18 = vmul.f32 %v835_v5, %v835_v5 }
 0x575   :  { %v841_v23 = vsel %vm46_vm0, %v837_v18, 0.0  ;;  %v836_v8 = vmul.f32 %v834_v7, %v834_v7 }
 0x576   :  { %842 = vadd.xlane.f32.xlu0 %v841_v23 }
 0x577   :  { %v838_v2 = vsel %vm46_vm0, %v836_v8, 0.0 }
 0x578   :  { %839 = vadd.xlane.f32.xlu1 %v838_v2 }
 0x5ff   :  { %v843_v9 = vpop.xlane.xlu0 %842 }
 0x600   :  { %v845_v10 = vmul.f32 0.125, %v843_v9 }
 0x601   :  { %v840_v11 = vpop.xlane.xlu1 %839 }
 0x602   :  { %v847_v12 = vadd.f32 1e-05, %v845_v10  ;;  %v844_v13 = vmul.f32 0.125, %v840_v11 }
 0x604   :  { %1294 = vrsqrt.f32 %v847_v12  ;;  %v846_v14 = vadd.f32 1e-05, %v844_v13 }
 0x606   :  { %1296 = vrsqrt.f32 %v846_v14 }
 0x611   :  { %v1295_v15 = vpop.eup %1294 }
 0x612   :  { %v851_v16 = vmul.f32 %v1295_v15, %v835_v5 }
 0x613   :  { %v1297_v21 = vpop.eup %1296 }
 0x614   :  { %v850_v22 = vmul.f32 %v1297_v21, %v834_v7  ;;  %v858_v24 = vmul.f32 %v1149_v17, %v851_v16 }
 0x616   :  { %v857_v25 = vmul.f32 %v1149_v17, %v850_v22  ;;  %v865_v30 = vadd.f32 %v1150_v28, %v858_v24 }
 0x618   :  { %v864_v29 = vadd.f32 %v1150_v28, %v857_v25 }
 0x61a   :  { %1238 = vmatprep.mubr.msk.f32.mxu0 %vm46_vm0, %v864_v29 }
 0x61b   :  { %1239 = vmatmul.mubr.msk.f32.vlgmr.msra.gmra.mxu0 %vm46_vm0, %v865_v30 }
 0x6db   :  { %v1240_v36 = vpop.f32.mrf.mxu0 }
 0x6dc   :  { %v952_v37 = vadd.f32 %v1240_v36, %v1151_v35 }
 0x6dd   :  { %v946_v38 = vpop.f32.mrf.mxu0 }
 0x6de   :  { %v947_v39 = vadd.f32 %v1151_v35, %v946_v38  ;;  %v956_v41 = vmax.f32 %v952_v37, 0.0 }
 0x6e0   :  { %v955_v40 = vmax.f32 %v947_v39, 0.0 }
 0x6e2   :  { %1249 = vmatprep.mubr.msk.f32.mxu1 %vm966_vm5, %v955_v40 }
 0x6e3   :  { %1250 = vmatmul.mubr.msk.f32.vlgmr.msra.gmra.mxu1 %vm966_vm5, %v956_v41 }
 0x7a3   :  { %v1251_v43 = vpop.f32.mrf.mxu1 }
 0x7a4   :  { %v1045_v44 = vadd.f32 %v1251_v43, %v1154_v42 }
 0x7a5   :  { %v1039_v45 = vpop.f32.mrf.mxu1 }
 0x7a6   :  { %v1040_v46 = vadd.f32 %v1154_v42, %v1039_v45  ;;  %v1049_v47 = vadd.f32 %v1045_v44, %v865_v30 }
 0x7a8   :  { %v1053_v48 = vsel %vm46_vm0, %v1049_v47, 0.0  ;;  %v1048_v49 = vadd.f32 %v1040_v46, %v864_v29 }
 0x7a9   :  { %1054 = vadd.xlane.f32.xlu0 %v1053_v48 }
 0x7aa   :  { %v1050_v50 = vsel %vm46_vm0, %v1048_v49, 0.0 }
 0x7ab   :  { %1051 = vadd.xlane.f32.xlu1 %v1050_v50 }
 0x832   :  { %v1055_v51 = vpop.xlane.xlu0 %1054 }
 0x833   :  { %v1057_v52 = vmul.f32 0.125, %v1055_v51 }
 0x834   :  { %v1052_v53 = vpop.xlane.xlu1 %1051 }
 0x835   :  { %v1059_v54 = vsub.f32 %v1049_v47, %v1057_v52  ;;  %v1056_v55 = vmul.f32 0.125, %v1052_v53 }
 0x837   :  { %v1058_v56 = vsub.f32 %v1048_v49, %v1056_v55  ;;  %v1061_v26 = vmul.f32 %v1059_v54, %v1059_v54 }
 0x839   :  { %v1065_v19 = vsel %vm46_vm0, %v1061_v26, 0.0  ;;  %v1060_v57 = vmul.f32 %v1058_v56, %v1058_v56 }
 0x83a   :  { %1066 = vadd.xlane.f32.xlu0 %v1065_v19 }
 0x83b   :  { %v1062_v58 = vsel %vm46_vm0, %v1060_v57, 0.0 }
 0x83c   :  { %1063 = vadd.xlane.f32.xlu1 %v1062_v58 }
 0x83d   :  { %1313 = shalt.err (!%p1310_p4)
}
 0x83e   :  { %s1351_s23 = smov 128   ;;  %s1352_s24 = smov 8   ;;  %v1157_v0 = vld [vmem:[%s1631_s8 + $0x4] ss:$0 sm:$0xff]  ;;  %v1158_v5 = vld [vmem:[%s1631_s8 + $0x5] ss:$0 sm:$0xff] }
 0x83f   :  { %1115 = dma.vmem_to_hbm [thread:$0]  %s1110_s7, 1024, %s1633_s10, [#allocation5], %s1351_s23, %s1351_s23, %s1352_s24  }
 0x840   :  { %s1353_s10 = smov [#allocation2]  }
 0x841   :  { %s1097_s29 = sshll.u32 %s1353_s10, 4  ;;  %s1098_s29 = int_to_ptr.vmem [resolvable:$true] %s1097_s29 }
 0x842   :  { %s1322_s30 = scalar_lea.vmem %s1098_s29, 256  ;;  %p1327_p6 = scmp.lt.s32.totalorder %s1098_s29, %s1098_s29 }
 0x843   :  { %p1323_p5 = scmp.ne.s32.totalorder %s1098_s29, %s1322_s30  ;;  %p1328_p7 = scmp.lt.s32.totalorder %s1322_s30, %s1322_s30 }
 0x845   :  { %p1329_p8 = por %p1328_p7, %p1327_p6 }
 0x847   :  { %p1330_p9 = pnand %p1329_p8, %p1323_p5 }
 0x8c3   :  { %v1067_v59 = vpop.xlane.xlu0 %1066 }
 0x8c4   :  { %v1069_v60 = vmul.f32 0.125, %v1067_v59 }
 0x8c5   :  { %v1064_v61 = vpop.xlane.xlu1 %1063 }
 0x8c6   :  { %v1071_v27 = vadd.f32 1e-05, %v1069_v60  ;;  %v1068_v20 = vmul.f32 0.125, %v1064_v61 }
 0x8c8   :  { %1298 = vrsqrt.f32 %v1071_v27  ;;  %v1070_v62 = vadd.f32 1e-05, %v1068_v20 }
 0x8ca   :  { %1300 = vrsqrt.f32 %v1070_v62 }
 0x8d5   :  { %v1299_v63 = vpop.eup %1298 }
 0x8d6   :  { %v1075_v3 = vmul.f32 %v1299_v63, %v1059_v54 }
 0x8d7   :  { %v1301_v4 = vpop.eup %1300 }
 0x8d8   :  { %v1074_v6 = vmul.f32 %v1301_v4, %v1058_v56  ;;  %v1082_v7 = vmul.f32 %v1157_v0, %v1075_v3 }
 0x8da   :  { %v1081_v18 = vmul.f32 %v1157_v0, %v1074_v6  ;;  %v1089_v23 = vadd.f32 %v1158_v5, %v1082_v7 }
 0x8dc   :  { %v1088_v8 = vadd.f32 %v1158_v5, %v1081_v18  ;;  %1091 = vst.msk [vmem:[#allocation2 + $0x8] sm:$0xff] %vm46_vm0, %v1089_v23 }
 0x8de   :  { %1090 = vst.msk [vmem:[#allocation2] sm:$0xff] %vm46_vm0, %v1088_v8 }
 0x8df   :  { %1333 = shalt.err (!%p1330_p9)
}
 0x8e0   :  { %1103 = dma.vmem_to_hbm [thread:$0]  %s1098_s29, 256, %s1632_s9, [#allocation3], %s1351_s23, %s1351_s23, %s1352_s24  }
 0x8e1   :  { %1342 = dma.done.wait [#allocation3], 256  }
 0x8e2   :  { %1343 = vsyncadd [#allocation3], 4294967040 }
 0x8e3   :  { %1344 = dma.done.wait [#allocation5], 1024  }
 0x8e4   :  { %1345 = vsyncadd [#allocation5], 4294966272 }
 0x8e5   :  { %1122 = vsyncpa [#allocation3], 1 }
 0x8e6   :  { %1123 = vsyncpa [#allocation5], 1 }

</bundles_post_ra>
